<compile_context>
chip_gen: v7x
topology: tpu7x:2x2x1
jax: 0.10.0
libtpu: 0.0.40
codegen_flags: <defaults>
</compile_context>

<pallas_src>
import jax
import jax.numpy as jnp
from jax import lax
from jax.experimental import pallas as pl
from jax.experimental.pallas import tpu as pltpu


_EPS = 1e-6
_LANE = 128
_SUBLANE = 8


def _vmem_budget():
    """Returns (vmem_limit_bytes, max_block_bytes, target_block_bytes)."""
    try:
        cap = int(pltpu.get_tpu_info().vmem_capacity_bytes)
    except Exception:
        cap = 64 * 1024 * 1024  # conservative default (v7x-class)
    if cap >= 96 * 1024 * 1024:
        # v5e / v6e: 128 MiB physical VMEM -> bigger blocks amortize step overhead.
        return 80 * 1024 * 1024, 16 * 1024 * 1024, 8 * 1024 * 1024
    # v7x-class: 64 MiB physical VMEM per TensorCore.
    return 48 * 1024 * 1024, 8 * 1024 * 1024, 4 * 1024 * 1024


def _round_up(v, m):
    return ((v + m - 1) // m) * m


# ----------------------- single-pass flat path ------------------------------

def _normalize_rows_kernel(x_ref, o_ref):
    """x_ref / o_ref: (b_tile, D) — several flattened samples, one per row."""
    x = x_ref[...]                                    # min/max exact in native dtype
    mn = jnp.min(x, axis=1, keepdims=True).astype(jnp.float32)
    mx = jnp.max(x, axis=1, keepdims=True).astype(jnp.float32)
    inv = 1.0 / (mx - mn + _EPS)                      # one divide per row
    xf = x_ref[...].astype(jnp.float32)               # re-read: short vreg live ranges
    o_ref[...] = ((xf - mn) * inv).astype(o_ref.dtype)


# ------------- two-pass flat path (rows too large to batch) -----------------

def _make_minmax_kernel(d_total, col_tile, needs_mask):
    def kernel(x_ref, mn_ref, mx_ref):
        k = pl.program_id(1)
        xf = x_ref[...].astype(jnp.float32)
        if needs_mask:
            col = k * col_tile + lax.broadcasted_iota(jnp.int32, xf.shape, 1)
            valid = col < d_total
            x_min_src = jnp.where(valid, xf, jnp.float32(jnp.inf))
            x_max_src = jnp.where(valid, xf, jnp.float32(-jnp.inf))
        else:
            x_min_src = x_max_src = xf
        bmn = jnp.min(x_min_src, axis=1, keepdims=True)
        bmx = jnp.max(x_max_src, axis=1, keepdims=True)

        @pl.when(k == 0)
        def _():
            mn_ref[...] = bmn
            mx_ref[...] = bmx

        @pl.when(k != 0)
        def _():
            mn_ref[...] = jnp.minimum(mn_ref[...], bmn)
            mx_ref[...] = jnp.maximum(mx_ref[...], bmx)

    return kernel


def _apply_norm_kernel(x_ref, mn_ref, mx_ref, o_ref):
    mn = mn_ref[...]
    inv = 1.0 / (mx_ref[...] - mn + _EPS)
    o_ref[...] = ((x_ref[...].astype(jnp.float32) - mn) * inv).astype(o_ref.dtype)


# ------------------------------ wrapper --------------------------------------

def normalize_layer(x, *, force_two_pass=False, col_tile=None):
    """x: (N, C, H, W). Matches PyTorch NormalizeLayer forward."""
    N, C, H, W = x.shape
    assert jnp.issubdtype(x.dtype, jnp.floating), "NormalizeLayer expects a float dtype"

    D = C * H * W
    itemsize = jnp.dtype(x.dtype).itemsize
    row_bytes = D * itemsize
    vmem_limit, max_block, target_block = _vmem_budget()

    x2 = x.reshape(N, D)  # contiguous NCHW sample -> free reshape in HBM

    use_flat = (not force_two_pass) and (min(N, _SUBLANE) * row_bytes <= max_block)

    if use_flat:
        if N <= _SUBLANE:
            b_tile = N  # full-dim row block (allowed even if not a multiple of 8)
        else:
            rows_fit = max(_SUBLANE,
                           (target_block // row_bytes) // _SUBLANE * _SUBLANE)
            # Never collapse to a single block when N > 8: keep >= 2 grid steps
            # so both of v7x's TensorCores get batch work.
            rows_half = _round_up(pl.cdiv(N, 2), _SUBLANE)
            b_tile = max(_SUBLANE, min(rows_fit, rows_half))

        out = pl.pallas_call(
            _normalize_rows_kernel,
            out_shape=jax.ShapeDtypeStruct((N, D), x.dtype),
            grid_spec=pltpu.PrefetchScalarGridSpec(
                num_scalar_prefetch=0,
                grid=(pl.cdiv(N, b_tile),),
                in_specs=[pl.BlockSpec((b_tile, D), lambda i: (i, 0))],
                out_specs=pl.BlockSpec((b_tile, D), lambda i: (i, 0)),
            ),
            compiler_params=pltpu.CompilerParams(
                dimension_semantics=("parallel",),
                vmem_limit_bytes=vmem_limit,
            ),
        )(x2)
        return out.reshape(N, C, H, W)

    # ----- two-pass path: each row tiled over D with lane-dense blocks -----
    b = min(N, _SUBLANE)
    if col_tile is not None:
        assert col_tile % _LANE == 0, "col_tile must be a multiple of 128"
        L = int(col_tile)
    else:
        l_fit = max(_LANE, (target_block // (b * itemsize)) // _LANE * _LANE)
        L = min(l_fit, _round_up(D, _LANE))
    K = pl.cdiv(D, L)
    needs_mask = (D % L) != 0

    mn, mx = pl.pallas_call(
        _make_minmax_kernel(D, L, needs_mask),
        out_shape=(jax.ShapeDtypeStruct((N, 1), jnp.float32),
                   jax.ShapeDtypeStruct((N, 1), jnp.float32)),
        grid_spec=pltpu.PrefetchScalarGridSpec(
            num_scalar_prefetch=0,
            grid=(pl.cdiv(N, b), K),
            in_specs=[pl.BlockSpec((b, L), lambda i, k: (i, k))],
            out_specs=(pl.BlockSpec((b, 1), lambda i, k: (i, 0)),
                       pl.BlockSpec((b, 1), lambda i, k: (i, 0))),
        ),
        compiler_params=pltpu.CompilerParams(
            dimension_semantics=("parallel", "arbitrary"),
            vmem_limit_bytes=vmem_limit,
        ),
    )(x2)

    out = pl.pallas_call(
        _apply_norm_kernel,
        out_shape=jax.ShapeDtypeStruct((N, D), x.dtype),
        grid_spec=pltpu.PrefetchScalarGridSpec(
            num_scalar_prefetch=0,
            grid=(pl.cdiv(N, b), K),
            in_specs=[pl.BlockSpec((b, L), lambda i, k: (i, k)),
                      pl.BlockSpec((b, 1), lambda i, k: (i, 0)),
                      pl.BlockSpec((b, 1), lambda i, k: (i, 0))],
            out_specs=pl.BlockSpec((b, L), lambda i, k: (i, k)),
        ),
        compiler_params=pltpu.CompilerParams(
            dimension_semantics=("parallel", "parallel"),
            vmem_limit_bytes=vmem_limit,
        ),
    )(x2, mn, mx)
    return out.reshape(N, C, H, W)


def normalize_layer_ref(x):
    min_val = jnp.min(x, axis=(1, 2, 3), keepdims=True)
    max_val = jnp.max(x, axis=(1, 2, 3), keepdims=True)
    return (x - min_val) / (max_val - min_val + 1e-6)


if __name__ == "__main__":
    # Primary small test matching the module's expected NCHW input.
    key = jax.random.PRNGKey(0)
    N, C, H, W = 2, 4, 16, 16
    x = jax.random.normal(key, (N, C, H, W), dtype=jnp.float32)
    out = jax.block_until_ready(normalize_layer(x))
    ref = normalize_layer_ref(x)
    assert out.shape == (N, C, H, W)
    assert out.dtype == x.dtype
    assert jnp.allclose(out, ref, atol=1e-5, rtol=1e-5), "mismatch vs reference (flat path)"

    # N not a multiple of the 8-row tile -> exercises the partial last row block.
    x2 = jax.random.normal(jax.random.PRNGKey(1), (10, 3, 10, 10), dtype=jnp.float32)
    o2 = jax.block_until_ready(normalize_layer(x2))
    assert jnp.allclose(o2, normalize_layer_ref(x2), atol=1e-5, rtol=1e-5), \
        "mismatch vs reference (partial row block)"

    # Force the two-pass tiled-over-D path (masked tail columns, K > 1) on a small shape.
    x3 = jax.random.normal(jax.random.PRNGKey(2), (3, 4, 15, 25), dtype=jnp.float32)
    o3 = jax.block_until_ready(normalize_layer(x3, force_two_pass=True, col_tile=256))
    assert jnp.allclose(o3, normalize_layer_ref(x3), atol=1e-5, rtol=1e-5), \
        "mismatch vs reference (two-pass path)"

    print("KERNEL_OK")
</pallas_src>

<mosaic_0001>
module attributes {stable_mosaic.version = 11 : i64} {
  func.func @_normalize_rows_kernel(%arg0: i32, %arg1: memref<2x1024xf32, #tpu.memory_space<vmem>>, %arg2: memref<2x1024xf32, #tpu.memory_space<vmem>>) attributes {dimension_semantics = [#tpu.dimension_semantics<parallel>], iteration_bounds = array<i64: 1>, scalar_prefetch = 0 : i64, scratch_operands = 0 : i64, tpu.core_type = #tpu.core_type<tc>, window_params = [{transform_indices = @transform_0, window_bounds = array<i64: 2, 1024>}, {transform_indices = @transform_1, window_bounds = array<i64: 2, 1024>}]} {
    %c0 = arith.constant 0 : index
    %c0_0 = arith.constant 0 : index
    %0 = vector.load %arg1[%c0, %c0_0] : memref<2x1024xf32, #tpu.memory_space<vmem>>, vector<2x1024xf32>
    %cst = arith.constant dense<0x7F800000> : vector<2xf32>
    %1 = vector.multi_reduction <minimumf>, %0, %cst [1] : vector<2x1024xf32> to vector<2xf32>
    %2 = vector.shape_cast %1 : vector<2xf32> to vector<2x1xf32>
    %cst_1 = arith.constant dense<0xFF800000> : vector<2xf32>
    %3 = vector.multi_reduction <maximumf>, %0, %cst_1 [1] : vector<2x1024xf32> to vector<2xf32>
    %4 = vector.shape_cast %3 : vector<2xf32> to vector<2x1xf32>
    %5 = arith.subf %4, %2 : vector<2x1xf32>
    %cst_2 = arith.constant 9.99999997E-7 : f32
    %6 = vector.broadcast %cst_2 : f32 to vector<2x1xf32>
    %7 = arith.addf %5, %6 : vector<2x1xf32>
    %cst_3 = arith.constant 1.000000e+00 : f32
    %8 = vector.broadcast %cst_3 : f32 to vector<2x1xf32>
    %9 = arith.divf %8, %7 : vector<2x1xf32>
    %c0_4 = arith.constant 0 : index
    %c0_5 = arith.constant 0 : index
    %10 = vector.load %arg1[%c0_4, %c0_5] : memref<2x1024xf32, #tpu.memory_space<vmem>>, vector<2x1024xf32>
    %11 = vector.broadcast %2 : vector<2x1xf32> to vector<2x1024xf32>
    %12 = arith.subf %10, %11 : vector<2x1024xf32>
    %13 = vector.broadcast %9 : vector<2x1xf32> to vector<2x1024xf32>
    %14 = arith.mulf %12, %13 : vector<2x1024xf32>
    %c0_6 = arith.constant 0 : index
    %c0_7 = arith.constant 0 : index
    %15 = vector.load %arg2[%c0_6, %c0_7] : memref<2x1024xf32, #tpu.memory_space<vmem>>, vector<2x1024xf32>
    tpu.vector_store %arg2[%c0_6, %c0_7], %14 {strides = array<i32>} : memref<2x1024xf32, #tpu.memory_space<vmem>>, vector<2x1024xf32>,
    return
  }
  func.func @transform_0(%arg0: i32) -> (i32, i32) {
    %c0_i32 = arith.constant 0 : i32
    %c0_i32_0 = arith.constant 0 : i32
    return %arg0, %c0_i32 : i32, i32
  }
  func.func @transform_1(%arg0: i32) -> (i32, i32) {
    %c0_i32 = arith.constant 0 : i32
    %c0_i32_0 = arith.constant 0 : i32
    return %arg0, %c0_i32 : i32, i32
  }
}

</mosaic_0001>

<bundles_post_ra>
// kernel: tpu_custom_call.1
= control target key start
LH: loop header
LB: loop body
LE: loop exit
PB: predicated region body
PF: predicated region fallthrough
CT: control target
= control target key end

     0   :  { %6 = vsyncpa [#allocation3], 0  ;;  %s255_s0 = inlined_call_operand.hbm [shape: f32[2,1024], index: 0, kind: input, shape index: {}]   ;;  %s256_s1 = inlined_call_operand.hbm [shape: f32[2,1024], index: 1, kind: output, shape index: {}]  }
   0x1   :  { %7 = vsyncpa [#allocation4], 0  ;;  %s201_s6 = smov [#allocation2]   ;;  %s153_s10 = scalar_lea.hbm %s255_s0, 256 }
   0x2   :  { %s14_s7 = sshll.u32 %s201_s6, 4  ;;  %p154_p0 = scmp.ne.s32.totalorder %s255_s0, %s153_s10  ;;  %s15_s7 = int_to_ptr.vmem [resolvable:$true] %s14_s7 }
   0x3   :  { %p157_p1 = scmp.lt.u32.totalorder %s153_s10, %s255_s0 }
   0x5   :  { %p159_p2 = pnand %p157_p1, %p154_p0 }
   0x7   :  { %162 = shalt.err (!%p159_p2)
}
   0x8   :  { %s163_s15 = scalar_lea.vmem %s15_s7, 256  ;;  %p168_p4 = scmp.lt.s32.totalorder %s15_s7, %s15_s7 }
   0x9   :  { %p164_p3 = scmp.ne.s32.totalorder %s15_s7, %s163_s15  ;;  %p169_p5 = scmp.lt.s32.totalorder %s163_s15, %s163_s15 }
   0xb   :  { %p170_p6 = por %p169_p5, %p168_p4 }
   0xd   :  { %p171_p7 = pnand %p170_p6, %p164_p3 }
   0xf   :  { %174 = shalt.err (!%p171_p7)
}
  0x10   :  { %17 = dma.hbm_to_vmem [thread:$0]  %s255_s0, 256, %s15_s7, [#allocation3]  }
  0x11   :  { %197 = dma.done.wait [#allocation3], 256  }
  0x12   :  { %198 = vsyncadd [#allocation3], 4294967040  ;;  %v29_v0 = vlaneseq  ;;  %v202_v1 = vmov 1983009808   ;;  %v21_v6 = vld [vmem:[#allocation2] sm:$0xff]  ;;  %v22_v7 = vld [vmem:[#allocation2 + $0x8] sm:$0xff] }
  0x13   :  { %v27_v2 = vunpack.c.l.s4 %v202_v1  ;;  %vm67_vm0 = vcmask 1041408   ;;  %v25_v8 = vcombine.high %v21_v6, %v21_v6  ;;  %v42_v10 = vcombine.high %v22_v7, %v22_v7  ;;  %s204_s0 = smov [#allocation5]  }
  0x14   :  { %v30_v3 = vshrl.u32 %v29_v0, 7  ;;  %v203_v49 = vmov 269488144   ;;  %s136_s18 = sshll.u32 %s204_s0, 4  ;;  %s137_s18 = int_to_ptr.vmem [resolvable:$true] %s136_s18 }
  0x15   :  { %v28_v4 = vunpack.c.0.s8 %v27_v2  ;;  %v108_v50 = vunpack.c.l.s4 %v203_v49  ;;  %s175_s19 = scalar_lea.vmem %s137_s18, 256  ;;  %p180_p9 = scmp.lt.s32.totalorder %s137_s18, %s137_s18 }
  0x16   :  { %p176_p8 = scmp.ne.s32.totalorder %s137_s18, %s175_s19  ;;  %p181_p10 = scmp.lt.s32.totalorder %s175_s19, %s175_s19 }
  0x17   :  { %v31_v5 = vsub.s32 %v28_v4, %v30_v3  ;;  %v109_v54 = vunpack.c.0.s8 %v108_v50 }
  0x18   :  { %p182_p11 = por %p181_p10, %p180_p9 }
  0x19   :  { %v32_v9 = vrot.slane %v21_v6, %v31_v5  ;;  %v49_v11 = vrot.slane %v22_v7, %v31_v5  ;;  %v39_v12 = vrot.slane %v25_v8, %v31_v5  ;;  %v56_v14 = vrot.slane %v42_v10, %v31_v5 }
  0x1a   :  { %v112_v55 = vsub.s32 %v109_v54, %v30_v3  ;;  %p183_p12 = pnand %p182_p11, %p176_p8 }
  0x1b   :  { %v40_v13 = vcombine.high %v32_v9, %v32_v9  ;;  %v57_v15 = vcombine.high %v49_v11, %v49_v11  ;;  %v68_v16 = vsel %vm67_vm0, %v32_v9, inf  ;;  %v72_v17 = vsel %vm67_vm0, %v49_v11, inf }
  0x1c   :  { %v85_v18 = vsel %vm67_vm0, %v32_v9, -inf  ;;  %v89_v19 = vsel %vm67_vm0, %v49_v11, -inf  ;;  %v41_v20 = vcombine.high %v39_v12, %v39_v12  ;;  %v58_v21 = vcombine.high %v56_v14, %v56_v14 }
  0x1d   :  { %v69_v22 = vsel %vm67_vm0, %v40_v13, inf  ;;  %v70_v23 = vsel %vm67_vm0, %v39_v12, inf  ;;  %v73_v24 = vmin.f32 %v68_v16, %v72_v17  ;;  %v74_v25 = vsel %vm67_vm0, %v57_v15, inf }
  0x1e   :  { %v76_v26 = vsel %vm67_vm0, %v56_v14, inf  ;;  %v86_v27 = vsel %vm67_vm0, %v40_v13, -inf  ;;  %v71_v28 = vsel %vm67_vm0, %v41_v20, inf  ;;  %v75_v29 = vmin.f32 %v69_v22, %v74_v25 }
  0x1f   :  { %v77_v30 = vmin.f32 %v70_v23, %v76_v26  ;;  %v78_v31 = vsel %vm67_vm0, %v58_v21, inf  ;;  %v87_v33 = vsel %vm67_vm0, %v39_v12, -inf  ;;  %v88_v34 = vsel %vm67_vm0, %v41_v20, -inf }
  0x20   :  { %v79_v32 = vmin.f32 %v71_v28, %v78_v31  ;;  %v90_v35 = vmax.f32 %v85_v18, %v89_v19  ;;  %v80_v36 = vmin.f32 %v73_v24, %v75_v29  ;;  %v91_v37 = vsel %vm67_vm0, %v57_v15, -inf }
  0x21   :  { %v93_v38 = vsel %vm67_vm0, %v56_v14, -inf  ;;  %v95_v39 = vsel %vm67_vm0, %v58_v21, -inf  ;;  %v92_v41 = vmax.f32 %v86_v27, %v91_v37 }
  0x22   :  { %v81_v40 = vmin.f32 %v77_v30, %v79_v32  ;;  %v94_v42 = vmax.f32 %v87_v33, %v93_v38  ;;  %v96_v43 = vmax.f32 %v88_v34, %v95_v39 }
  0x23   :  { %v97_v45 = vmax.f32 %v90_v35, %v92_v41 }
  0x24   :  { %v82_v44 = vmin.f32 %v80_v36, %v81_v40  ;;  %v98_v46 = vmax.f32 %v94_v42, %v96_v43 }
  0x26   :  { %83 = vmin.xlane.f32.xlu0 %v82_v44  ;;  %v99_v47 = vmax.f32 %v97_v45, %v98_v46 }
  0x2a   :  { %100 = vmax.xlane.f32.xlu0 %v99_v47 }
  0xb3   :  { %v84_v48 = vpop.xlane.xlu0 %83 }
  0xb4   :  { %v113_v56 = vrot.slane %v84_v48, %v112_v55 }
  0xb6   :  { %v115_v58 = vsub.f32 %v21_v6, %v113_v56  ;;  %v116_v59 = vsub.f32 %v22_v7, %v113_v56 }
  0xb7   :  { %v101_v51 = vpop.xlane.xlu0 %100 }
  0xb8   :  { %v102_v52 = vsub.f32 %v101_v51, %v84_v48 }
  0xba   :  { %v103_v53 = vadd.f32 1e-06, %v102_v52 }
  0xbc   :  { %151 = vrcp.f32 %v103_v53 }
  0xc6   :  { %v152_v57 = vpop.eup %151 }
  0xc7   :  { %v124_v60 = vrot.slane %v152_v57, %v112_v55 }
  0xc9   :  { %v126_v61 = vmul.f32 %v124_v60, %v115_v58  ;;  %v127_v62 = vmul.f32 %v124_v60, %v116_v59 }
  0xcb   :  { %128 = vst [vmem:[#allocation5] sm:$0xff] %v126_v61  ;;  %129 = vst [vmem:[#allocation5 + $0x8] sm:$0xff] %v127_v62 }
  0xcc   :  { %186 = shalt.err (!%p183_p12)
}
  0xcd   :  { %s187_s22 = scalar_lea.hbm %s256_s1, 256 }
  0xce   :  { %p188_p13 = scmp.ne.s32.totalorder %s256_s1, %s187_s22  ;;  %p191_p0 = scmp.lt.u32.totalorder %s187_s22, %s256_s1 }
  0xd0   :  { %p193_p1 = pnand %p191_p0, %p188_p13 }
  0xd2   :  { %196 = shalt.err (!%p193_p1)
}
  0xd3   :  { %139 = dma.vmem_to_hbm [thread:$0]  %s137_s18, 256, %s256_s1, [#allocation4]  }
  0xd4   :  { %199 = dma.done.wait [#allocation4], 256  }
  0xd5   :  { %200 = vsyncadd [#allocation4], 4294967040 }
  0xd6   :  { %143 = vsyncpa [#allocation3], 1 }
  0xd7   :  { %144 = vsyncpa [#allocation4], 1 }

</bundles_post_ra>
